<compile_context>
chip_gen: v5e
topology: v5e:2x2
jax: 0.10.0
libtpu: 0.0.40
codegen_flags: <defaults>
</compile_context>

<pallas_src>
import jax
import jax.numpy as jnp
from jax import lax
from jax.experimental import pallas as pl
from jax.experimental.pallas import tpu as pltpu


def _round_up(x, m):
    return (x + m - 1) // m * m


def cnn_kernel(x_ref, w_ref, b_ref, o_ref):
    """One batch tile: conv1d (valid, stride 1) -> max over length -> bias -> ReLU.

    x_ref: (L_out, B_T, K*Cin)   bf16  wrapper-side im2col operand
    w_ref: (K*Cin, Cout_pad)     bf16  im2col-folded weights (lane-dense)
    b_ref: (1, Cout_pad)         f32
    o_ref: (B_T, Cout_pad)       f32
    """
    l_out, b_t, km = x_ref.shape

    # Flat M dimension for the MXU: (L_out*B_T, K*Cin).  b_t % 16 == 0, so this
    # reshape is layout-preserving (no relayout copy).
    cols = x_ref[...].reshape(l_out * b_t, km)
    acc = jnp.dot(cols, w_ref[...],
                  preferred_element_type=jnp.float32)      # (L_out*B_T, Cout_pad)

    # Max over length FIRST (rows for length l live at [l*b_t, (l+1)*b_t), all
    # slice starts are multiples of b_t >= 16 -> aligned, pure VPU maxes).
    red = acc[:b_t, :]
    for l in range(1, l_out):
        red = jnp.maximum(red, acc[l * b_t:(l + 1) * b_t, :])

    # Bias + ReLU on the reduced slab (exact: bias is constant over L, ReLU is
    # monotone, so max_t relu(y_t + b) == relu(max_t y_t + b)).
    o_ref[...] = jnp.maximum(red + b_ref[...], 0.0).astype(o_ref.dtype)


def cnn_forward(x_ncl, weight_oik, bias_o, *, b_tile=None):
    """x_ncl: (B, Cin, L) f32 (PyTorch NCL layout).
    weight_oik: (Cout, Cin, K) (PyTorch Conv1d weight layout).
    bias_o: (Cout,).
    Returns (B, Cout) f32 == torch.max(torch.relu(conv1d(x)), dim=2)[0]."""
    B, Cin, L = x_ncl.shape
    Cout, _, K = weight_oik.shape
    assert L >= K
    l_out = L - K + 1

    # Batch tile: big (amortize per-step overhead / large DMAs) but aim for
    # ~8 grid steps so v7x megacore has work; multiple of 16 (bf16 sublane
    # tile); capped at 1024 rows to stay far under the 32 MiB scoped VMEM.
    if b_tile is None:
        b_tile = max(16, min(1024, _round_up(pl.cdiv(B, 8), 16)))
    else:
        b_tile = max(16, _round_up(b_tile, 16))
    b_pad = _round_up(B, b_tile)
    cout_pad = _round_up(max(Cout, 128), 128)      # lane-dense; do NOT over-pad

    # Single glue pass (fuses into one XLA copy): pad B, NCL -> (L, B, Cin),
    # im2col fold, cast to bf16.  The kernel then does zero relayout work.
    x = x_ncl
    if b_pad != B:
        x = jnp.pad(x, ((0, b_pad - B), (0, 0), (0, 0)))
    x_lbc = jnp.transpose(x, (2, 0, 1))                             # (L, B_pad, Cin)
    cols = jnp.concatenate([x_lbc[k:k + l_out] for k in range(K)],
                           axis=-1).astype(jnp.bfloat16)            # (L_out, B_pad, K*Cin)

    # (Cout, Cin, K) -> (K*Cin, Cout_pad): im2col-folded, lane-dense weights.
    w2 = jnp.transpose(weight_oik, (2, 1, 0)).reshape(K * Cin, Cout)
    w2 = jnp.pad(w2, ((0, 0), (0, cout_pad - Cout))).astype(jnp.bfloat16)
    b2 = jnp.pad(bias_o, (0, cout_pad - Cout)).reshape(1, cout_pad).astype(jnp.float32)

    grid = (b_pad // b_tile,)
    out = pl.pallas_call(
        cnn_kernel,
        out_shape=jax.ShapeDtypeStruct((b_pad, cout_pad), jnp.float32),
        grid=grid,
        in_specs=[
            pl.BlockSpec((l_out, b_tile, K * Cin), lambda i: (0, i, 0)),
            pl.BlockSpec((K * Cin, cout_pad), lambda i: (0, 0)),
            pl.BlockSpec((1, cout_pad), lambda i: (0, 0)),
        ],
        out_specs=pl.BlockSpec((b_tile, cout_pad), lambda i: (i, 0)),
        compiler_params=pltpu.CompilerParams(
            dimension_semantics=("parallel",),      # megacore-shards B on v7x
            vmem_limit_bytes=32 * 1024 * 1024,      # v7x-safe; raise on v5e/v6e
        ),
    )(cols, w2, b2)
    return out[:B, :Cout]


def reference_forward(x_ncl, weight_oik, bias_o):
    """Pure-JAX f32 reference (lax conv) for correctness checking."""
    y = lax.conv_general_dilated(
        x_ncl, weight_oik,
        window_strides=(1,), padding="VALID",
        dimension_numbers=("NCH", "OIH", "NCH"))
    y = y + bias_o[None, :, None]
    return jnp.max(jnp.maximum(y, 0.0), axis=2)


if __name__ == "__main__":
    # Small shapes consistent with the module's forward pass.
    B, Cin, L = 2, 4, 16
    Cout, K = 8, 5

    key = jax.random.PRNGKey(0)
    kx, kw, kb, kx2 = jax.random.split(key, 4)

    x = jax.random.normal(kx, (B, Cin, L), dtype=jnp.float32)

    # Deterministic params mimicking PyTorch Conv1d init: U(+-sqrt(1/fan_in)).
    bound = 1.0 / (Cin * K) ** 0.5
    weight = jax.random.uniform(kw, (Cout, Cin, K), dtype=jnp.float32,
                                minval=-bound, maxval=bound)
    bias = jax.random.uniform(kb, (Cout,), dtype=jnp.float32,
                              minval=-bound, maxval=bound)

    # Default tile (single grid step at this toy batch).
    out = jax.block_until_ready(cnn_forward(x, weight, bias))
    ref = reference_forward(x, weight, bias)
    assert out.shape == (B, Cout)
    # bf16 matmul inputs with f32 accumulation -> slightly looser tolerance.
    assert jnp.allclose(out, ref, atol=2e-2, rtol=2e-2)

    # Larger (still small) batch: exercises a multi-step "parallel" grid and
    # batch padding (b_tile=16 -> b_pad=48, 3 grid steps).
    B2 = 37
    x2 = jax.random.normal(kx2, (B2, Cin, L), dtype=jnp.float32)
    out2 = jax.block_until_ready(cnn_forward(x2, weight, bias, b_tile=16))
    ref2 = reference_forward(x2, weight, bias)
    assert out2.shape == (B2, Cout)
    assert jnp.allclose(out2, ref2, atol=2e-2, rtol=2e-2)

    print("KERNEL_OK")
</pallas_src>

<mosaic_0001>
module attributes {stable_mosaic.version = 11 : i64} {
  func.func @cnn_kernel(%arg0: i32, %arg1: memref<12x16x20xbf16, #tpu.memory_space<vmem>>, %arg2: memref<20x128xbf16, #tpu.memory_space<vmem>>, %arg3: memref<1x128xf32, #tpu.memory_space<vmem>>, %arg4: memref<16x128xf32, #tpu.memory_space<vmem>>) attributes {dimension_semantics = [#tpu.dimension_semantics<parallel>], iteration_bounds = array<i64: 1>, scalar_prefetch = 0 : i64, scratch_operands = 0 : i64, tpu.core_type = #tpu.core_type<tc>, window_params = [{transform_indices = @transform_0, window_bounds = array<i64: 12, 16, 20>}, {pipeline_mode = #tpu.pipeline_mode<synchronous>, transform_indices = @transform_1, window_bounds = array<i64: 20, 128>}, {pipeline_mode = #tpu.pipeline_mode<synchronous>, transform_indices = @transform_2, window_bounds = array<i64: 1, 128>}, {transform_indices = @transform_3, window_bounds = array<i64: 16, 128>}]} {
    %c0 = arith.constant 0 : index
    %c0_0 = arith.constant 0 : index
    %c0_1 = arith.constant 0 : index
    %0 = vector.load %arg1[%c0, %c0_0, %c0_1] : memref<12x16x20xbf16, #tpu.memory_space<vmem>>, vector<12x16x20xbf16>
    %1 = vector.shape_cast %0 : vector<12x16x20xbf16> to vector<192x20xbf16>
    %c0_2 = arith.constant 0 : index
    %c0_3 = arith.constant 0 : index
    %2 = vector.load %arg2[%c0_2, %c0_3] : memref<20x128xbf16, #tpu.memory_space<vmem>>, vector<20x128xbf16>
    %cst = arith.constant dense<0.000000e+00> : vector<192x128xf32>
    %3 = tpu.matmul %1, %2, %cst {dimension_numbers = #tpu.dot_dimension_numbers<[1], [0], [0], [1], [0, 0, 1, 1], [], []>} : vector<192x20xbf16>, vector<20x128xbf16>, vector<192x128xf32> -> vector<192x128xf32>
    %4 = vector.extract_strided_slice %3 {offsets = [0, 0], sizes = [16, 128], strides = [1, 1]} : vector<192x128xf32> to vector<16x128xf32>
    %5 = vector.extract_strided_slice %3 {offsets = [16, 0], sizes = [16, 128], strides = [1, 1]} : vector<192x128xf32> to vector<16x128xf32>
    %6 = arith.maximumf %4, %5 : vector<16x128xf32>
    %7 = vector.extract_strided_slice %3 {offsets = [32, 0], sizes = [16, 128], strides = [1, 1]} : vector<192x128xf32> to vector<16x128xf32>
    %8 = arith.maximumf %6, %7 : vector<16x128xf32>
    %9 = vector.extract_strided_slice %3 {offsets = [48, 0], sizes = [16, 128], strides = [1, 1]} : vector<192x128xf32> to vector<16x128xf32>
    %10 = arith.maximumf %8, %9 : vector<16x128xf32>
    %11 = vector.extract_strided_slice %3 {offsets = [64, 0], sizes = [16, 128], strides = [1, 1]} : vector<192x128xf32> to vector<16x128xf32>
    %12 = arith.maximumf %10, %11 : vector<16x128xf32>
    %13 = vector.extract_strided_slice %3 {offsets = [80, 0], sizes = [16, 128], strides = [1, 1]} : vector<192x128xf32> to vector<16x128xf32>
    %14 = arith.maximumf %12, %13 : vector<16x128xf32>
    %15 = vector.extract_strided_slice %3 {offsets = [96, 0], sizes = [16, 128], strides = [1, 1]} : vector<192x128xf32> to vector<16x128xf32>
    %16 = arith.maximumf %14, %15 : vector<16x128xf32>
    %17 = vector.extract_strided_slice %3 {offsets = [112, 0], sizes = [16, 128], strides = [1, 1]} : vector<192x128xf32> to vector<16x128xf32>
    %18 = arith.maximumf %16, %17 : vector<16x128xf32>
    %19 = vector.extract_strided_slice %3 {offsets = [128, 0], sizes = [16, 128], strides = [1, 1]} : vector<192x128xf32> to vector<16x128xf32>
    %20 = arith.maximumf %18, %19 : vector<16x128xf32>
    %21 = vector.extract_strided_slice %3 {offsets = [144, 0], sizes = [16, 128], strides = [1, 1]} : vector<192x128xf32> to vector<16x128xf32>
    %22 = arith.maximumf %20, %21 : vector<16x128xf32>
    %23 = vector.extract_strided_slice %3 {offsets = [160, 0], sizes = [16, 128], strides = [1, 1]} : vector<192x128xf32> to vector<16x128xf32>
    %24 = arith.maximumf %22, %23 : vector<16x128xf32>
    %25 = vector.extract_strided_slice %3 {offsets = [176, 0], sizes = [16, 128], strides = [1, 1]} : vector<192x128xf32> to vector<16x128xf32>
    %26 = arith.maximumf %24, %25 : vector<16x128xf32>
    %c0_4 = arith.constant 0 : index
    %c0_5 = arith.constant 0 : index
    %27 = vector.load %arg3[%c0_4, %c0_5] : memref<1x128xf32, #tpu.memory_space<vmem>>, vector<1x128xf32>
    %28 = vector.broadcast %27 : vector<1x128xf32> to vector<16x128xf32>
    %29 = arith.addf %26, %28 : vector<16x128xf32>
    %cst_6 = arith.constant 0.000000e+00 : f32
    %30 = vector.broadcast %cst_6 : f32 to vector<16x128xf32>
    %31 = arith.maximumf %29, %30 : vector<16x128xf32>
    %c0_7 = arith.constant 0 : index
    %c0_8 = arith.constant 0 : index
    %32 = vector.load %arg4[%c0_7, %c0_8] : memref<16x128xf32, #tpu.memory_space<vmem>>, vector<16x128xf32>
    tpu.vector_store %arg4[%c0_7, %c0_8], %31 {strides = array<i32>} : memref<16x128xf32, #tpu.memory_space<vmem>>, vector<16x128xf32>,
    return
  }
  func.func @transform_0(%arg0: i32) -> (i32, i32, i32) {
    %c0_i32 = arith.constant 0 : i32
    %c0_i32_0 = arith.constant 0 : i32
    %c0_i32_1 = arith.constant 0 : i32
    return %c0_i32, %arg0, %c0_i32_0 : i32, i32, i32
  }
  func.func @transform_1(%arg0: i32) -> (i32, i32) {
    %c0_i32 = arith.constant 0 : i32
    %c0_i32_0 = arith.constant 0 : i32
    %c0_i32_1 = arith.constant 0 : i32
    return %c0_i32, %c0_i32_0 : i32, i32
  }
  func.func @transform_2(%arg0: i32) -> (i32, i32) {
    %c0_i32 = arith.constant 0 : i32
    %c0_i32_0 = arith.constant 0 : i32
    %c0_i32_1 = arith.constant 0 : i32
    return %c0_i32, %c0_i32_0 : i32, i32
  }
  func.func @transform_3(%arg0: i32) -> (i32, i32) {
    %c0_i32 = arith.constant 0 : i32
    %c0_i32_0 = arith.constant 0 : i32
    return %arg0, %c0_i32 : i32, i32
  }
}

</mosaic_0001>

<bundles_post_ra>
// kernel: tpu_custom_call.1
= control target key start
LH: loop header
LB: loop body
LE: loop exit
PB: predicated region body
PF: predicated region fallthrough
CT: control target
= control target key end

     0   :  { %8 = vsyncpa [#allocation3], 0  ;;  %s526_s0 = inlined_call_operand.hbm [shape: bf16[12,16,20], index: 0, kind: input, shape index: {}]   ;;  %s527_s1 = inlined_call_operand.hbm [shape: bf16[20,128], index: 1, kind: input, shape index: {}]   ;;  %s528_s2 = inlined_call_operand.vmem [shape: f32[1,128], index: 2, kind: input, shape index: {}]   ;;  %s529_s3 = inlined_call_operand.hbm [shape: f32[16,128], index: 3, kind: output, shape index: {}]  }
   0x1   :  { %9 = vsyncpa [#allocation6], 0 }
   0x2   :  { %10 = vsyncpa [#allocation4], 0  ;;  %s15_s14 = sshll.u32 %s526_s0, 4  ;;  %s475_s15 = smov [#allocation2]   ;;  %s16_s14 = int_to_ptr.hbm [resolvable:$true] %s15_s14 }
   0x3   :  { %s17_s16 = sshll.u32 %s475_s15, 4  ;;  %s28_s19 = sshll.u32 %s527_s1, 4  ;;  %s18_s16 = int_to_ptr.vmem [resolvable:$true] %s17_s16  ;;  %s29_s19 = int_to_ptr.hbm [resolvable:$true] %s28_s19 }
   0x4   :  { %s476_s20 = smov 64   ;;  %s477_s21 = smov 4  }
   0x5   :  { %23 = dma.hbm_to_vmem [thread:$0]  %s16_s14, 1536, %s18_s16, [#allocation3], %s476_s20, %s476_s20, %s477_s21  }
   0x6   :  { %s478_s22 = smov [#allocation5]  }
   0x7   :  { %s30_s23 = sshll.u32 %s478_s22, 4  ;;  %s31_s23 = int_to_ptr.vmem [resolvable:$true] %s30_s23 }
   0x8   :  { %36 = dma.hbm_to_vmem [thread:$0]  %s29_s19, 192, %s31_s23, [#allocation6], %s476_s20, %s476_s20, %s477_s21  }
   0x9   :  { %469 = dma.done.wait [#allocation3], 1536  }
   0xa   :  { %470 = vsyncadd [#allocation3], 4294965760 }
   0xb   :  { %471 = dma.done.wait [#allocation6], 192  }
   0xc   :  { %472 = vsyncadd [#allocation6], 4294967104  ;;  %v74_v0 = vld [vmem:[#allocation5 + $0x8] sm:$0x3]  ;;  %vm181_vm0 = vcmask 1041408   ;;  %v382_v4 = vld [vmem:[#allocation5] sm:$0xff] }
   0xd   :  { %v140_v1 = vunpack.c.l.b16 %v74_v0  ;;  %v370_v5 = vld [vmem:[#allocation2] sm:$0xff]  ;;  %v373_v6 = vld [vmem:[#allocation2 + $0x18] sm:$0xff]  ;;  %vm144_vm1 = vcmask 162816   ;;  %v376_v7 = vld [vmem:[#allocation2 + $0x30] sm:$0xff]  ;;  %s479_s24 = smov [#allocation7]   ;;  %s292_s28 = sshll.u32 %s529_s3, 4  ;;  %s293_s28 = int_to_ptr.hbm [resolvable:$true] %s292_s28 }
   0xe   :  { %v379_v8 = vld [vmem:[#allocation2 + $0x48] sm:$0xff]  ;;  %v374_v10 = vld [vmem:[#allocation2 + $0x20] sm:$0xff]  ;;  %v377_v11 = vld [vmem:[#allocation2 + $0x38] sm:$0xff]  ;;  %s290_s25 = sshll.u32 %s479_s24, 4  ;;  %s481_s29 = smov 8   ;;  %s291_s25 = int_to_ptr.vmem [resolvable:$true] %s290_s25 }
   0xf   :  { %v142_v2 = vpack.c.b16 %v140_v1, %v140_v1  ;;  %v371_v9 = vld [vmem:[#allocation2 + $0x8] sm:$0xff]  ;;  %v380_v12 = vld [vmem:[#allocation2 + $0x50] sm:$0xff]  ;;  %v378_v15 = vld [vmem:[#allocation2 + $0x40] sm:$0xff] }
  0x10   :  { %v372_v13 = vld [vmem:[#allocation2 + $0x10] sm:$0xff]  ;;  %v375_v14 = vld [vmem:[#allocation2 + $0x28] sm:$0xff]  ;;  %v381_v16 = vld [vmem:[#allocation2 + $0x58] sm:$0xff] }
  0x11   :  { %v183_v3 = vsel %vm181_vm0, %v142_v2, 0  ;;  %v396_v55 = vld [vmem:[%s528_s2] ss:$0 sm:$0xff]  ;;  %s480_s2 = smov 128  }
  0x12   :  { %191 = vmatpush.bf16.msra.mxu0 %v183_v3  ;;  %383 = vmatpush.bf16.msra.mxu1 %v183_v3 }
  0x13   :  { %384 = vmatpush.bf16.msra.mxu2 %v183_v3  ;;  %385 = vmatpush.bf16.msra.mxu3 %v183_v3 }
  0x16   :  { %192 = vmatpush.bf16.msra.mxu0 %v382_v4  ;;  %386 = vmatpush.bf16.msra.mxu1 %v382_v4 }
  0x17   :  { %387 = vmatpush.bf16.msra.mxu2 %v382_v4  ;;  %388 = vmatpush.bf16.msra.mxu3 %v382_v4 }
  0x19   :  { %358 = vmatmul.msk.bf16.vlgmr.msra.gmra.mxu0 %vm144_vm1, %v370_v5  ;;  %361 = vmatmul.msk.bf16.vlgmr.msra.gmra.mxu1 %vm144_vm1, %v373_v6 }
  0x1a   :  { %364 = vmatmul.msk.bf16.vlgmr.msra.gmra.mxu2 %vm144_vm1, %v376_v7  ;;  %367 = vmatmul.msk.bf16.vlgmr.msra.gmra.mxu3 %vm144_vm1, %v379_v8 }
  0x29   :  { %359 = vmatmul.msk.bf16.gmra.mxu0 %vm144_vm1, %v371_v9  ;;  %362 = vmatmul.msk.bf16.gmra.mxu1 %vm144_vm1, %v374_v10 }
  0x2a   :  { %365 = vmatmul.msk.bf16.gmra.mxu2 %vm144_vm1, %v377_v11  ;;  %368 = vmatmul.msk.bf16.gmra.mxu3 %vm144_vm1, %v380_v12 }
  0x39   :  { %360 = vmatmul.msk.bf16.gmra.mxu0 %vm144_vm1, %v372_v13  ;;  %363 = vmatmul.msk.bf16.gmra.mxu1 %vm144_vm1, %v375_v14 }
  0x3a   :  { %366 = vmatmul.msk.bf16.gmra.mxu2 %vm144_vm1, %v378_v15  ;;  %369 = vmatmul.msk.bf16.gmra.mxu3 %vm144_vm1, %v381_v16 }
  0x96   :  { %v194_v17 = vpop.f32.mrf.mxu0  ;;  %v209_v18 = vpop.f32.mrf.mxu1 }
  0x9d   :  { %v224_v19 = vpop.f32.mrf.mxu2  ;;  %v239_v20 = vpop.f32.mrf.mxu3 }
  0x9e   :  { %v196_v21 = vpop.f32.mrf.mxu0  ;;  %v211_v22 = vpop.f32.mrf.mxu1 }
  0xa5   :  { %v226_v23 = vpop.f32.mrf.mxu2  ;;  %v241_v26 = vpop.f32.mrf.mxu3 }
  0xa6   :  { %v199_v24 = vpop.f32.mrf.mxu0  ;;  %v214_v25 = vpop.f32.mrf.mxu1 }
  0xa7   :  { %v254_v31 = vmax.f32 %v194_v17, %v199_v24 }
  0xad   :  { %v229_v27 = vpop.f32.mrf.mxu2  ;;  %v244_v30 = vpop.f32.mrf.mxu3 }
  0xae   :  { %v201_v28 = vpop.f32.mrf.mxu0  ;;  %v216_v29 = vpop.f32.mrf.mxu1 }
  0xaf   :  { %v255_v39 = vmax.f32 %v196_v21, %v201_v28 }
  0xb5   :  { %v231_v32 = vpop.f32.mrf.mxu2  ;;  %v246_v38 = vpop.f32.mrf.mxu3 }
  0xb6   :  { %v204_v33 = vpop.f32.mrf.mxu0  ;;  %v219_v36 = vpop.f32.mrf.mxu1 }
  0xb7   :  { %v256_v34 = vmax.f32 %v254_v31, %v204_v33 }
  0xb9   :  { %v258_v35 = vmax.f32 %v256_v34, %v209_v18 }
  0xbb   :  { %v260_v37 = vmax.f32 %v258_v35, %v214_v25 }
  0xbd   :  { %v262_v40 = vmax.f32 %v260_v37, %v219_v36  ;;  %v234_v44 = vpop.f32.mrf.mxu2  ;;  %v249_v52 = vpop.f32.mrf.mxu3 }
  0xbe   :  { %v206_v41 = vpop.f32.mrf.mxu0  ;;  %v221_v49 = vpop.f32.mrf.mxu1 }
  0xbf   :  { %v264_v42 = vmax.f32 %v262_v40, %v224_v19  ;;  %v257_v43 = vmax.f32 %v255_v39, %v206_v41 }
  0xc1   :  { %v266_v45 = vmax.f32 %v264_v42, %v229_v27  ;;  %v259_v46 = vmax.f32 %v257_v43, %v211_v22 }
  0xc3   :  { %v268_v47 = vmax.f32 %v266_v45, %v234_v44  ;;  %v261_v48 = vmax.f32 %v259_v46, %v216_v29 }
  0xc5   :  { %v270_v50 = vmax.f32 %v268_v47, %v239_v20  ;;  %v263_v51 = vmax.f32 %v261_v48, %v221_v49  ;;  %v236_v58 = vpop.f32.mrf.mxu2  ;;  %v251_v0 = vpop.f32.mrf.mxu3 }
  0xc7   :  { %v265_v53 = vmax.f32 %v263_v51, %v226_v23  ;;  %v272_v54 = vmax.f32 %v270_v50, %v244_v30 }
  0xc9   :  { %v274_v56 = vmax.f32 %v272_v54, %v249_v52  ;;  %v267_v57 = vmax.f32 %v265_v53, %v231_v32 }
  0xcb   :  { %v280_v59 = vadd.f32 %v396_v55, %v274_v56  ;;  %v269_v60 = vmax.f32 %v267_v57, %v236_v58 }
  0xcd   :  { %v282_v61 = vmax.f32 %v280_v59, 0.0  ;;  %v271_v62 = vmax.f32 %v269_v60, %v241_v26 }
  0xcf   :  { %284 = vst [vmem:[#allocation7] sm:$0xff] %v282_v61  ;;  %v273_v63 = vmax.f32 %v271_v62, %v246_v38 }
  0xd1   :  { %v275_v1 = vmax.f32 %v273_v63, %v251_v0 }
  0xd3   :  { %v281_v2 = vadd.f32 %v396_v55, %v275_v1 }
  0xd5   :  { %v283_v3 = vmax.f32 %v281_v2, 0.0 }
  0xd7   :  { %285 = vst [vmem:[#allocation7 + $0x8] sm:$0xff] %v283_v3 }
  0xd8   :  { %298 = dma.vmem_to_hbm [thread:$0]  %s291_s25, 256, %s293_s28, [#allocation4], %s480_s2, %s480_s2, %s481_s29  }
  0xd9   :  { %473 = dma.done.wait [#allocation4], 256  }
  0xda   :  { %474 = vsyncadd [#allocation4], 4294967040 }
  0xdb   :  { %303 = vsyncpa [#allocation3], 1 }
  0xdc   :  { %304 = vsyncpa [#allocation6], 1 }
  0xdd   :  { %305 = vsyncpa [#allocation4], 1 }

</bundles_post_ra>
